<compile_context>
chip_gen: v5e
topology: v5e:2x2
jax: 0.10.0
libtpu: 0.0.40
codegen_flags: <defaults>
</compile_context>

<pallas_src>
import functools

import jax
import jax.numpy as jnp
from jax.experimental import pallas as pl
from jax.experimental.pallas import tpu as pltpu

_LANE = 128
_SUBLANE = 8
_SINGLE_SHOT_MAX_B = 64
_BATCH_TILE = 512


def _round_up(n, m):
    return ((n + m - 1) // m) * m


def _vae_kernel(x_ref, eps_ref, w_ref, b_ref, out_ref, *, dp, hp, zp):
    """One batch-tile of the VAE forward.  All buffers lane-aligned (x128).

    x_ref   : (TB, dp)  f32, zero padded
    eps_ref : (TB, zp)  f32, zero padded
    w_ref   : (rp, hp + 2*zp + hp + dp)  bf16 packed [w_enc | w_mu|w_std | w_l2h | w_dec]
    b_ref   : (1,  hp + 2*zp + hp + dp)  f32 packed biases, same column layout
    out_ref : (TB, dp + 2*zp)            f32 packed [recon || mu || std]
    """
    # Static column offsets into the packed slabs (all multiples of 128).
    o_enc = 0
    o_ms = o_enc + hp            # fused mu||std projection: (hp, 2*zp)
    o_l2h = o_ms + 2 * zp
    o_dec = o_l2h + hp

    x = x_ref[...]
    eps = eps_ref[...]

    # ---- encode ----
    h = jnp.dot(x.astype(jnp.bfloat16), w_ref[0:dp, o_enc:o_enc + hp],
                preferred_element_type=jnp.float32) + b_ref[:, o_enc:o_enc + hp]
    h = jnp.maximum(h, 0.0)  # ReLU (f32 VPU)

    # ---- fused mu || std projection (single MXU pass) ----
    ms = jnp.dot(h.astype(jnp.bfloat16), w_ref[0:hp, o_ms:o_ms + 2 * zp],
                 preferred_element_type=jnp.float32) + b_ref[:, o_ms:o_ms + 2 * zp]
    mu = ms[:, 0:zp]
    std = ms[:, zp:2 * zp]

    # ---- reparameterize (f32) ----
    latent = mu + std * eps

    # ---- decode ----
    h2 = jnp.dot(latent.astype(jnp.bfloat16), w_ref[0:zp, o_l2h:o_l2h + hp],
                 preferred_element_type=jnp.float32) + b_ref[:, o_l2h:o_l2h + hp]
    h2 = jnp.maximum(h2, 0.0)  # ReLU
    logits = jnp.dot(h2.astype(jnp.bfloat16), w_ref[0:hp, o_dec:o_dec + dp],
                     preferred_element_type=jnp.float32) + b_ref[:, o_dec:o_dec + dp]
    recon = jax.nn.sigmoid(logits)  # EUP, f32

    # ---- single lane-dense output block: recon || mu || std ----
    out_ref[:, 0:dp] = recon
    out_ref[:, dp:dp + zp] = mu
    out_ref[:, dp + zp:dp + 2 * zp] = std


def make_vae_forward(input_size, hidden_dim, z_dim):
    """Returns (prepare_params, forward) for the given logical model dims."""
    dp = _round_up(input_size, _LANE)
    hp = _round_up(hidden_dim, _LANE)
    zp = _round_up(z_dim, _LANE)
    rp = max(dp, hp, zp)                       # shared row count of the weight slab
    w_cols = hp + 2 * zp + hp + dp
    out_cols = dp + 2 * zp

    kernel = functools.partial(_vae_kernel, dp=dp, hp=hp, zp=zp)

    def prepare_params(params):
        """Pack the 5 Linear layers into one bf16 weight slab + one f32 bias slab.

        Weights are stored transposed (in_features, out_features) so the kernel
        does row-major x @ W + b.  Zero-padded to 128 multiples and concatenated
        along lanes: [w_enc | w_mu | w_std | w_l2h | w_dec].  Done once.
        """
        def pad_w(w_t, cols):
            w_t = w_t.astype(jnp.bfloat16)
            return jnp.pad(w_t, ((0, rp - w_t.shape[0]), (0, cols - w_t.shape[1])))

        def pad_b(b, cols):
            b = b.reshape(1, -1).astype(jnp.float32)
            return jnp.pad(b, ((0, 0), (0, cols - b.shape[1])))

        w_pack = jnp.concatenate([
            pad_w(params["w_enc"], hp),
            pad_w(params["w_mu"], zp),
            pad_w(params["w_std"], zp),
            pad_w(params["w_l2h"], hp),
            pad_w(params["w_dec"], dp),
        ], axis=1)
        b_pack = jnp.concatenate([
            pad_b(params["b_enc"], hp),
            pad_b(params["b_mu"], zp),
            pad_b(params["b_std"], zp),
            pad_b(params["b_l2h"], hp),
            pad_b(params["b_dec"], dp),
        ], axis=1)
        assert w_pack.shape == (rp, w_cols) and b_pack.shape == (1, w_cols)
        return w_pack, b_pack

    def _cost(b):
        # Logical dims only (padded-lane FLOPs would overstate 4-8x).
        flops = 2 * b * (input_size * hidden_dim + hidden_dim * (2 * z_dim)
                         + z_dim * hidden_dim + hidden_dim * input_size)
        bytes_accessed = (4 * b * (input_size + z_dim)          # x, eps
                          + 2 * rp * w_cols + 4 * w_cols        # weights bf16, biases f32
                          + 4 * b * (input_size + 2 * z_dim))   # outputs
        return pl.CostEstimate(flops=flops,
                               transcendentals=b * input_size,  # sigmoid on EUP
                               bytes_accessed=bytes_accessed)

    @jax.jit
    def forward(x, eps, w_pack, b_pack):
        b = x.shape[0]

        if b <= _SINGLE_SHOT_MAX_B:
            # ---- single-shot, gridless path (overhead-bound regime) ----
            bp = _round_up(b, _SUBLANE)
            x_p = jnp.pad(x.astype(jnp.float32),
                          ((0, bp - b), (0, dp - x.shape[1])))
            eps_p = jnp.pad(eps.astype(jnp.float32),
                            ((0, bp - b), (0, zp - eps.shape[1])))
            out = pl.pallas_call(
                kernel,
                out_shape=jax.ShapeDtypeStruct((bp, out_cols), jnp.float32),
                in_specs=[pl.BlockSpec(memory_space=pltpu.MemorySpace.VMEM)] * 4,
                out_specs=pl.BlockSpec(memory_space=pltpu.MemorySpace.VMEM),
                cost_estimate=_cost(b),
            )(x_p, eps_p, w_pack, b_pack)
        else:
            # ---- batch-tiled path; "parallel" axis uses both TCs on v7x ----
            tb = _BATCH_TILE
            bp = _round_up(b, tb)
            x_p = jnp.pad(x.astype(jnp.float32),
                          ((0, bp - b), (0, dp - x.shape[1])))
            eps_p = jnp.pad(eps.astype(jnp.float32),
                            ((0, bp - b), (0, zp - eps.shape[1])))
            out = pl.pallas_call(
                kernel,
                out_shape=jax.ShapeDtypeStruct((bp, out_cols), jnp.float32),
                grid_spec=pltpu.PrefetchScalarGridSpec(
                    num_scalar_prefetch=0,
                    grid=(bp // tb,),
                    in_specs=[
                        pl.BlockSpec((tb, dp), lambda i: (i, 0)),
                        pl.BlockSpec((tb, zp), lambda i: (i, 0)),
                        pl.BlockSpec((rp, w_cols), lambda i: (0, 0)),
                        pl.BlockSpec((1, w_cols), lambda i: (0, 0)),
                    ],
                    out_specs=pl.BlockSpec((tb, out_cols), lambda i: (i, 0)),
                ),
                compiler_params=pltpu.CompilerParams(
                    dimension_semantics=("parallel",)),
                cost_estimate=_cost(b),
            )(x_p, eps_p, w_pack, b_pack)

        # One row slice, then static column splits of the packed block.
        out_b = out[:b]
        recon = out_b[:, 0:input_size]
        mu = out_b[:, dp:dp + z_dim]
        std = out_b[:, dp + zp:dp + zp + z_dim]
        return recon, mu, std

    return prepare_params, forward


def _init_params(key, input_size, hidden_dim, z_dim):
    """Deterministic synthetic init. PyTorch nn.Linear stores weight as
    (out_features, in_features); we store the transpose (in, out) so the kernel
    computes x @ W + b directly."""
    ks = jax.random.split(key, 10)
    s = 0.05

    def lin(kw, kb, fan_in, fan_out):
        w = jax.random.normal(kw, (fan_in, fan_out), jnp.float32) * s
        b = jax.random.normal(kb, (1, fan_out), jnp.float32) * s
        return w, b

    w_enc, b_enc = lin(ks[0], ks[1], input_size, hidden_dim)
    w_mu, b_mu = lin(ks[2], ks[3], hidden_dim, z_dim)
    w_std, b_std = lin(ks[4], ks[5], hidden_dim, z_dim)
    w_l2h, b_l2h = lin(ks[6], ks[7], z_dim, hidden_dim)
    w_dec, b_dec = lin(ks[8], ks[9], hidden_dim, input_size)

    return dict(
        w_enc=w_enc, b_enc=b_enc,
        w_mu=w_mu, b_mu=b_mu,
        w_std=w_std, b_std=b_std,
        w_l2h=w_l2h, b_l2h=b_l2h,
        w_dec=w_dec, b_dec=b_dec,
    )


def _reference_forward(x, eps, p):
    """Pure-JAX f32 reference matching the PyTorch semantics exactly."""
    h = jax.nn.relu(x @ p["w_enc"] + p["b_enc"])
    mu = h @ p["w_mu"] + p["b_mu"]
    std = h @ p["w_std"] + p["b_std"]
    latent = mu + std * eps
    h2 = jax.nn.relu(latent @ p["w_l2h"] + p["b_l2h"])
    recon = jax.nn.sigmoid(h2 @ p["w_dec"] + p["b_dec"])
    return recon, mu, std


if __name__ == "__main__":
    # Small shapes consistent with the module's forward.
    INPUT_SIZE = 64
    HIDDEN_DIM = 32
    Z_DIM = 16

    key = jax.random.PRNGKey(0)
    k_x, k_eps, k_params, k_x2, k_eps2 = jax.random.split(key, 5)

    params = _init_params(k_params, INPUT_SIZE, HIDDEN_DIM, Z_DIM)
    prepare_params, vae_forward = make_vae_forward(INPUT_SIZE, HIDDEN_DIM, Z_DIM)
    w_pack, b_pack = prepare_params(params)

    # bf16 weights in the kernel -> compare against the f32 reference with a
    # relaxed tolerance.
    TOL = 2e-2

    # ---- small batch (single-shot path) ----
    B1 = 8
    x1 = jax.random.uniform(k_x, (B1, INPUT_SIZE), jnp.float32)
    eps1 = jax.random.normal(k_eps, (B1, Z_DIM), jnp.float32)  # torch.randn_like(std)
    r1, mu1, std1 = vae_forward(x1, eps1, w_pack, b_pack)
    jax.block_until_ready((r1, mu1, std1))
    r1_ref, mu1_ref, std1_ref = _reference_forward(x1, eps1, params)
    assert r1.shape == (B1, INPUT_SIZE) and mu1.shape == (B1, Z_DIM) and std1.shape == (B1, Z_DIM)
    assert jnp.allclose(r1, r1_ref, atol=TOL), "recon mismatch (small batch)"
    assert jnp.allclose(mu1, mu1_ref, atol=TOL), "mu mismatch (small batch)"
    assert jnp.allclose(std1, std1_ref, atol=TOL), "std mismatch (small batch)"

    # ---- larger batch (tiled / parallel-grid path) ----
    B2 = 1000
    x2 = jax.random.uniform(k_x2, (B2, INPUT_SIZE), jnp.float32)
    eps2 = jax.random.normal(k_eps2, (B2, Z_DIM), jnp.float32)
    r2, mu2, std2 = vae_forward(x2, eps2, w_pack, b_pack)
    jax.block_until_ready((r2, mu2, std2))
    r2_ref, mu2_ref, std2_ref = _reference_forward(x2, eps2, params)
    assert jnp.allclose(r2, r2_ref, atol=TOL), "recon mismatch (tiled batch)"
    assert jnp.allclose(mu2, mu2_ref, atol=TOL), "mu mismatch (tiled batch)"
    assert jnp.allclose(std2, std2_ref, atol=TOL), "std mismatch (tiled batch)"

    print("KERNEL_OK")
</pallas_src>

<mosaic_0001>
module attributes {stable_mosaic.version = 11 : i64} {
  func.func @_vae_kernel(%arg0: memref<8x128xf32, #tpu.memory_space<vmem>>, %arg1: memref<8x128xf32, #tpu.memory_space<vmem>>, %arg2: memref<128x640xbf16, #tpu.memory_space<vmem>>, %arg3: memref<1x640xf32, #tpu.memory_space<vmem>>, %arg4: memref<8x384xf32, #tpu.memory_space<vmem>>) attributes {dimension_semantics = [], scalar_prefetch = 0 : i64, scratch_operands = 0 : i64, tpu.core_type = #tpu.core_type<tc>} {
    %c0 = arith.constant 0 : index
    %c0_0 = arith.constant 0 : index
    %0 = vector.load %arg0[%c0, %c0_0] : memref<8x128xf32, #tpu.memory_space<vmem>>, vector<8x128xf32>
    %c0_1 = arith.constant 0 : index
    %c0_2 = arith.constant 0 : index
    %1 = vector.load %arg1[%c0_1, %c0_2] : memref<8x128xf32, #tpu.memory_space<vmem>>, vector<8x128xf32>
    %2 = arith.truncf %0 : vector<8x128xf32> to vector<8x128xbf16>
    %c0_3 = arith.constant 0 : index
    %c0_4 = arith.constant 0 : index
    %3 = vector.load %arg2[%c0_3, %c0_4] : memref<128x640xbf16, #tpu.memory_space<vmem>>, vector<128x128xbf16>
    %cst = arith.constant dense<0.000000e+00> : vector<8x128xf32>
    %4 = tpu.matmul %2, %3, %cst {dimension_numbers = #tpu.dot_dimension_numbers<[1], [0], [0], [1], [0, 0, 1, 1], [], []>} : vector<8x128xbf16>, vector<128x128xbf16>, vector<8x128xf32> -> vector<8x128xf32>
    %c0_5 = arith.constant 0 : index
    %c0_6 = arith.constant 0 : index
    %5 = vector.load %arg3[%c0_5, %c0_6] : memref<1x640xf32, #tpu.memory_space<vmem>>, vector<1x128xf32>
    %6 = vector.broadcast %5 : vector<1x128xf32> to vector<8x128xf32>
    %7 = arith.addf %4, %6 : vector<8x128xf32>
    %cst_7 = arith.constant 0.000000e+00 : f32
    %8 = vector.broadcast %cst_7 : f32 to vector<8x128xf32>
    %9 = arith.maximumf %7, %8 : vector<8x128xf32>
    %10 = arith.truncf %9 : vector<8x128xf32> to vector<8x128xbf16>
    %c0_8 = arith.constant 0 : index
    %c128 = arith.constant 128 : index
    %11 = vector.load %arg2[%c0_8, %c128] : memref<128x640xbf16, #tpu.memory_space<vmem>>, vector<128x256xbf16>
    %cst_9 = arith.constant dense<0.000000e+00> : vector<8x256xf32>
    %12 = tpu.matmul %10, %11, %cst_9 {dimension_numbers = #tpu.dot_dimension_numbers<[1], [0], [0], [1], [0, 0, 1, 1], [], []>} : vector<8x128xbf16>, vector<128x256xbf16>, vector<8x256xf32> -> vector<8x256xf32>
    %c0_10 = arith.constant 0 : index
    %c128_11 = arith.constant 128 : index
    %13 = vector.load %arg3[%c0_10, %c128_11] : memref<1x640xf32, #tpu.memory_space<vmem>>, vector<1x256xf32>
    %14 = vector.broadcast %13 : vector<1x256xf32> to vector<8x256xf32>
    %15 = arith.addf %12, %14 : vector<8x256xf32>
    %16 = vector.extract_strided_slice %15 {offsets = [0, 0], sizes = [8, 128], strides = [1, 1]} : vector<8x256xf32> to vector<8x128xf32>
    %17 = vector.extract_strided_slice %15 {offsets = [0, 128], sizes = [8, 128], strides = [1, 1]} : vector<8x256xf32> to vector<8x128xf32>
    %18 = arith.mulf %17, %1 : vector<8x128xf32>
    %19 = arith.addf %16, %18 : vector<8x128xf32>
    %20 = arith.truncf %19 : vector<8x128xf32> to vector<8x128xbf16>
    %c0_12 = arith.constant 0 : index
    %c384 = arith.constant 384 : index
    %21 = vector.load %arg2[%c0_12, %c384] : memref<128x640xbf16, #tpu.memory_space<vmem>>, vector<128x128xbf16>
    %cst_13 = arith.constant dense<0.000000e+00> : vector<8x128xf32>
    %22 = tpu.matmul %20, %21, %cst_13 {dimension_numbers = #tpu.dot_dimension_numbers<[1], [0], [0], [1], [0, 0, 1, 1], [], []>} : vector<8x128xbf16>, vector<128x128xbf16>, vector<8x128xf32> -> vector<8x128xf32>
    %c0_14 = arith.constant 0 : index
    %c384_15 = arith.constant 384 : index
    %23 = vector.load %arg3[%c0_14, %c384_15] : memref<1x640xf32, #tpu.memory_space<vmem>>, vector<1x128xf32>
    %24 = vector.broadcast %23 : vector<1x128xf32> to vector<8x128xf32>
    %25 = arith.addf %22, %24 : vector<8x128xf32>
    %cst_16 = arith.constant 0.000000e+00 : f32
    %26 = vector.broadcast %cst_16 : f32 to vector<8x128xf32>
    %27 = arith.maximumf %25, %26 : vector<8x128xf32>
    %28 = arith.truncf %27 : vector<8x128xf32> to vector<8x128xbf16>
    %c0_17 = arith.constant 0 : index
    %c512 = arith.constant 512 : index
    %29 = vector.load %arg2[%c0_17, %c512] : memref<128x640xbf16, #tpu.memory_space<vmem>>, vector<128x128xbf16>
    %cst_18 = arith.constant dense<0.000000e+00> : vector<8x128xf32>
    %30 = tpu.matmul %28, %29, %cst_18 {dimension_numbers = #tpu.dot_dimension_numbers<[1], [0], [0], [1], [0, 0, 1, 1], [], []>} : vector<8x128xbf16>, vector<128x128xbf16>, vector<8x128xf32> -> vector<8x128xf32>
    %c0_19 = arith.constant 0 : index
    %c512_20 = arith.constant 512 : index
    %31 = vector.load %arg3[%c0_19, %c512_20] : memref<1x640xf32, #tpu.memory_space<vmem>>, vector<1x128xf32>
    %32 = vector.broadcast %31 : vector<1x128xf32> to vector<8x128xf32>
    %33 = arith.addf %30, %32 : vector<8x128xf32>
    %34 = arith.negf %33 : vector<8x128xf32>
    %35 = math.exp %34 : vector<8x128xf32>
    %cst_21 = arith.constant 1.000000e+00 : f32
    %36 = vector.broadcast %cst_21 : f32 to vector<8x128xf32>
    %37 = arith.addf %36, %35 : vector<8x128xf32>
    %38 = arith.divf %36, %37 : vector<8x128xf32>
    %c0_22 = arith.constant 0 : index
    %c0_23 = arith.constant 0 : index
    %39 = vector.load %arg4[%c0_22, %c0_23] : memref<8x384xf32, #tpu.memory_space<vmem>>, vector<8x128xf32>
    tpu.vector_store %arg4[%c0_22, %c0_23], %38 {strides = array<i32>} : memref<8x384xf32, #tpu.memory_space<vmem>>, vector<8x128xf32>,
    %c0_24 = arith.constant 0 : index
    %c128_25 = arith.constant 128 : index
    %40 = vector.load %arg4[%c0_24, %c128_25] : memref<8x384xf32, #tpu.memory_space<vmem>>, vector<8x128xf32>
    tpu.vector_store %arg4[%c0_24, %c128_25], %16 {strides = array<i32>} : memref<8x384xf32, #tpu.memory_space<vmem>>, vector<8x128xf32>,
    %c0_26 = arith.constant 0 : index
    %c256 = arith.constant 256 : index
    %41 = vector.load %arg4[%c0_26, %c256] : memref<8x384xf32, #tpu.memory_space<vmem>>, vector<8x128xf32>
    tpu.vector_store %arg4[%c0_26, %c256], %17 {strides = array<i32>} : memref<8x384xf32, #tpu.memory_space<vmem>>, vector<8x128xf32>,
    return
  }
}

</mosaic_0001>

<bundles_post_ra>
// kernel: forward.1
= control target key start
LH: loop header
LB: loop body
LE: loop exit
PB: predicated region body
PF: predicated region fallthrough
CT: control target
= control target key end

     0   :  { %9 = vsyncpa [#allocation3], 0  ;;  %s678_s18 = smov [#allocation2]   ;;  %s679_s20 = smov 320   ;;  %s736_s0 = inlined_call_operand.vmem [shape: f32[8,128], index: 0, kind: input, shape index: {}]   ;;  %s737_s1 = inlined_call_operand.vmem [shape: f32[8,128], index: 1, kind: input, shape index: {}]   ;;  %s738_s2 = inlined_call_operand.hbm [shape: bf16[128,640], index: 2, kind: input, shape index: {}]   ;;  %s739_s3 = inlined_call_operand.vmem [shape: f32[1,640], index: 3, kind: input, shape index: {}]   ;;  %s740_s4 = inlined_call_operand.vmem [shape: f32[8,384], index: 4, kind: output, shape index: {}]  }
   0x1   :  { %s18_s17 = sshll.u32 %s738_s2, 4  ;;  %s20_s19 = sshll.u32 %s678_s18, 4  ;;  %s19_s17 = int_to_ptr.hbm [resolvable:$true] %s18_s17  ;;  %s21_s19 = int_to_ptr.vmem [resolvable:$true] %s20_s19 }
   0x2   :  { %s680_s21 = smov 20  }
   0x3   :  { %26 = dma.hbm_to_vmem [thread:$0]  %s19_s17, 5120, %s21_s19, [#allocation3], %s679_s20, %s679_s20, %s680_s21  }
   0x4   :  { %676 = dma.done.wait [#allocation3], 5120  }
   0x5   :  { %677 = vsyncadd [#allocation3], 4294962176  ;;  %v471_v0 = vld [vmem:[#allocation2 + $0x118] sm:$0xf]  ;;  %v609_v1 = vld [vmem:[#allocation2 + $0x128] sm:$0xf0] }
   0x6   :  { %v467_v2 = vld [vmem:[#allocation2 + $0xf0] sm:$0xf]  ;;  %v472_v3 = vor.u32 %v609_v1, %v471_v0  ;;  %v608_v4 = vld [vmem:[#allocation2 + $0x100] sm:$0xf0]  ;;  %v463_v6 = vld [vmem:[#allocation2 + $0xc8] sm:$0xf] }
   0x7   :  { %v468_v5 = vor.u32 %v608_v4, %v467_v2  ;;  %v607_v7 = vld [vmem:[#allocation2 + $0xd8] sm:$0xf0]  ;;  %v625_v9 = vld [vmem:[#allocation2 + $0x12c] sm:$0xf0]  ;;  %v624_v10 = vld [vmem:[#allocation2 + $0x120] sm:$0xf] }
   0x8   :  { %104 = vmatpush.bf16.msra.mxu0 %v472_v3  ;;  %v531_v8 = vld [vmem:[#allocation2 + $0x11c] sm:$0xf]  ;;  %v533_v11 = vld [vmem:[#allocation2 + $0x130] sm:$0xf0]  ;;  %v464_v12 = vor.u32 %v607_v7, %v463_v6  ;;  %v623_v16 = vld [vmem:[#allocation2 + $0x104] sm:$0xf0] }
   0x9   :  { %v532_v13 = vor.u32 %v625_v9, %v531_v8  ;;  %v536_v14 = vor.u32 %v624_v10, %v533_v11  ;;  %v523_v15 = vld [vmem:[#allocation2 + $0xf4] sm:$0xf]  ;;  %v622_v17 = vld [vmem:[#allocation2 + $0xf8] sm:$0xf]  ;;  %v459_v18 = vld [vmem:[#allocation2 + $0xa0] sm:$0xf] }
   0xa   :  { %v606_v19 = vld [vmem:[#allocation2 + $0xb0] sm:$0xf0]  ;;  %v525_v20 = vld [vmem:[#allocation2 + $0x108] sm:$0xf0]  ;;  %v524_v21 = vor.u32 %v623_v16, %v523_v15  ;;  %v621_v24 = vld [vmem:[#allocation2 + $0xdc] sm:$0xf0] }
   0xb   :  { %221 = vmatpush.bf16.msra.mxu1 %v532_v13  ;;  %234 = vmatpush.bf16.msra.mxu2 %v536_v14  ;;  %v528_v22 = vor.u32 %v622_v17, %v525_v20  ;;  %v515_v23 = vld [vmem:[#allocation2 + $0xcc] sm:$0xf]  ;;  %v620_v25 = vld [vmem:[#allocation2 + $0xd0] sm:$0xf]  ;;  %v517_v26 = vld [vmem:[#allocation2 + $0xe0] sm:$0xf0]  ;;  %v460_v27 = vor.u32 %v606_v19, %v459_v18 }
   0xc   :  { %105 = vmatpush.bf16.msra.mxu0 %v468_v5  ;;  %v455_v28 = vld [vmem:[#allocation2 + $0x78] sm:$0xf]  ;;  %v605_v29 = vld [vmem:[#allocation2 + $0x88] sm:$0xf0]  ;;  %v507_v30 = vld [vmem:[#allocation2 + $0xa4] sm:$0xf]  ;;  %v516_v31 = vor.u32 %v621_v24, %v515_v23  ;;  %v520_v32 = vor.u32 %v620_v25, %v517_v26 }
   0xd   :  { %v619_v33 = vld [vmem:[#allocation2 + $0xb4] sm:$0xf0]  ;;  %v618_v34 = vld [vmem:[#allocation2 + $0xa8] sm:$0xf]  ;;  %v509_v35 = vld [vmem:[#allocation2 + $0xb8] sm:$0xf0]  ;;  %v456_v36 = vor.u32 %v605_v29, %v455_v28 }
   0xe   :  { %v451_v37 = vld [vmem:[#allocation2 + $0x50] sm:$0xf]  ;;  %v604_v38 = vld [vmem:[#allocation2 + $0x60] sm:$0xf0]  ;;  %v508_v39 = vor.u32 %v619_v33, %v507_v30  ;;  %v512_v40 = vor.u32 %v618_v34, %v509_v35  ;;  %v499_v41 = vld [vmem:[#allocation2 + $0x7c] sm:$0xf] }
   0xf   :  { %222 = vmatpush.bf16.msra.mxu1 %v524_v21  ;;  %235 = vmatpush.bf16.msra.mxu2 %v528_v22  ;;  %v617_v42 = vld [vmem:[#allocation2 + $0x8c] sm:$0xf0]  ;;  %v616_v43 = vld [vmem:[#allocation2 + $0x80] sm:$0xf]  ;;  %v501_v44 = vld [vmem:[#allocation2 + $0x90] sm:$0xf0]  ;;  %v452_v45 = vor.u32 %v604_v38, %v451_v37 }
  0x10   :  { %106 = vmatpush.bf16.msra.mxu0 %v464_v12  ;;  %v447_v46 = vld [vmem:[#allocation2 + $0x28] sm:$0xf]  ;;  %v603_v47 = vld [vmem:[#allocation2 + $0x38] sm:$0xf0]  ;;  %v500_v48 = vor.u32 %v617_v42, %v499_v41  ;;  %v504_v49 = vor.u32 %v616_v43, %v501_v44  ;;  %v491_v50 = vld [vmem:[#allocation2 + $0x54] sm:$0xf] }
  0x11   :  { %v615_v51 = vld [vmem:[#allocation2 + $0x64] sm:$0xf0]  ;;  %v614_v52 = vld [vmem:[#allocation2 + $0x58] sm:$0xf]  ;;  %v493_v53 = vld [vmem:[#allocation2 + $0x68] sm:$0xf0]  ;;  %v448_v54 = vor.u32 %v603_v47, %v447_v46 }
  0x12   :  { %v443_v55 = vld [vmem:[#allocation2] sm:$0xf]  ;;  %v602_v56 = vld [vmem:[#allocation2 + $0x10] sm:$0xf0]  ;;  %v492_v57 = vor.u32 %v615_v51, %v491_v50  ;;  %v496_v58 = vor.u32 %v614_v52, %v493_v53  ;;  %v483_v62 = vld [vmem:[#allocation2 + $0x2c] sm:$0xf] }
  0x13   :  { %223 = vmatpush.bf16.msra.mxu1 %v516_v31  ;;  %236 = vmatpush.bf16.msra.mxu2 %v520_v32  ;;  %v444_v59 = vor.u32 %v602_v56, %v443_v55  ;;  %v33_v60 = vld [vmem:[%s736_s0] sm:$0xff]  ;;  %v612_v0 = vld [vmem:[#allocation2 + $0x30] sm:$0xf]  ;;  %v611_v5 = vld [vmem:[#allocation2 + $0x14] sm:$0xf0] }
  0x14   :  { %107 = vmatpush.bf16.msra.mxu0 %v460_v27  ;;  %v35_v61 = vpack.c.bf16 %v33_v60, %v33_v60  ;;  %v613_v63 = vld [vmem:[#allocation2 + $0x3c] sm:$0xf0]  ;;  %v485_v2 = vld [vmem:[#allocation2 + $0x40] sm:$0xf0]  ;;  %v610_v6 = vld [vmem:[#allocation2 + $0x8] sm:$0xf] }
  0x15   :  { %v484_v1 = vor.u32 %v613_v63, %v483_v62  ;;  %v488_v3 = vor.u32 %v612_v0, %v485_v2  ;;  %v475_v4 = vld [vmem:[#allocation2 + $0x4] sm:$0xf]  ;;  %v477_v8 = vld [vmem:[#allocation2 + $0x18] sm:$0xf0]  ;;  %v633_v11 = vld [vmem:[#allocation2 + $0x134] sm:$0xf0] }
  0x16   :  { %v476_v7 = vor.u32 %v611_v5, %v475_v4  ;;  %v480_v9 = vor.u32 %v610_v6, %v477_v8  ;;  %v567_v10 = vld [vmem:[#allocation2 + $0x124] sm:$0xf]  ;;  %v563_v12 = vld [vmem:[#allocation2 + $0xfc] sm:$0xf]  ;;  %v632_v14 = vld [vmem:[#allocation2 + $0x10c] sm:$0xf0] }
  0x17   :  { %224 = vmatpush.bf16.msra.mxu1 %v508_v39  ;;  %237 = vmatpush.bf16.msra.mxu2 %v512_v40  ;;  %v568_v13 = vor.u32 %v633_v11, %v567_v10  ;;  %v564_v15 = vor.u32 %v632_v14, %v563_v12  ;;  %v559_v16 = vld [vmem:[#allocation2 + $0xd4] sm:$0xf]  ;;  %v631_v17 = vld [vmem:[#allocation2 + $0xe4] sm:$0xf0]  ;;  %v555_v19 = vld [vmem:[#allocation2 + $0xac] sm:$0xf] }
  0x18   :  { %108 = vmatpush.bf16.msra.mxu0 %v456_v36  ;;  %v560_v18 = vor.u32 %v631_v17, %v559_v16  ;;  %v630_v20 = vld [vmem:[#allocation2 + $0xbc] sm:$0xf0]  ;;  %v551_v28 = vld [vmem:[#allocation2 + $0x84] sm:$0xf]  ;;  %v629_v29 = vld [vmem:[#allocation2 + $0x94] sm:$0xf0] }
  0x19   :  { %318 = vmatpush.bf16.msra.mxu3 %v568_v13  ;;  %v556_v21 = vor.u32 %v630_v20, %v555_v19  ;;  %v645_v22 = vld [vmem:[%s739_s3] ss:$0 sm:$0xff]  ;;  %v552_v30 = vor.u32 %v629_v29, %v551_v28  ;;  %v547_v31 = vld [vmem:[#allocation2 + $0x5c] sm:$0xf]  ;;  %v628_v32 = vld [vmem:[#allocation2 + $0x6c] sm:$0xf0] }
  0x1a   :  { %v548_v33 = vor.u32 %v628_v32, %v547_v31  ;;  %v543_v34 = vld [vmem:[#allocation2 + $0x34] sm:$0xf]  ;;  %v627_v35 = vld [vmem:[#allocation2 + $0x44] sm:$0xf0]  ;;  %v539_v37 = vld [vmem:[#allocation2 + $0xc] sm:$0xf] }
  0x1b   :  { %225 = vmatpush.bf16.msra.mxu1 %v500_v48  ;;  %238 = vmatpush.bf16.msra.mxu2 %v504_v49  ;;  %v544_v36 = vor.u32 %v627_v35, %v543_v34  ;;  %v626_v38 = vld [vmem:[#allocation2 + $0x1c] sm:$0xf0]  ;;  %v599_v40 = vld [vmem:[#allocation2 + $0x128] sm:$0xf]  ;;  %v641_v41 = vld [vmem:[#allocation2 + $0x138] sm:$0xf0] }
  0x1c   :  { %109 = vmatpush.bf16.msra.mxu0 %v452_v45  ;;  %v540_v39 = vor.u32 %v626_v38, %v539_v37  ;;  %v595_v42 = vld [vmem:[#allocation2 + $0x100] sm:$0xf]  ;;  %v600_v43 = vor.u32 %v641_v41, %v599_v40  ;;  %v640_v44 = vld [vmem:[#allocation2 + $0x110] sm:$0xf0]  ;;  %v591_v46 = vld [vmem:[#allocation2 + $0xd8] sm:$0xf] }
  0x1d   :  { %319 = vmatpush.bf16.msra.mxu3 %v564_v15  ;;  %v596_v45 = vor.u32 %v640_v44, %v595_v42  ;;  %v639_v47 = vld [vmem:[#allocation2 + $0xe8] sm:$0xf0]  ;;  %v587_v49 = vld [vmem:[#allocation2 + $0xb0] sm:$0xf]  ;;  %v638_v50 = vld [vmem:[#allocation2 + $0xc0] sm:$0xf0] }
  0x1e   :  { %v592_v48 = vor.u32 %v639_v47, %v591_v46  ;;  %v135_v51 = vld [vmem:[%s739_s3 + $0x1] sm:$0x3]  ;;  %v588_v52 = vor.u32 %v638_v50, %v587_v49  ;;  %v583_v53 = vld [vmem:[#allocation2 + $0x88] sm:$0xf]  ;;  %v635_v8 = vld [vmem:[#allocation2 + $0x48] sm:$0xf0] }
  0x1f   :  { %226 = vmatpush.bf16.msra.mxu1 %v492_v57  ;;  %239 = vmatpush.bf16.msra.mxu2 %v496_v58  ;;  %v137_v55 = vperm.slane %v135_v51, 0  ;;  %v579_v57 = vld [vmem:[#allocation2 + $0x60] sm:$0xf]  ;;  %v636_v58 = vld [vmem:[#allocation2 + $0x70] sm:$0xf0]  ;;  %v138_v62 = vperm.slane %v135_v51, 1 }
  0x20   :  { %110 = vmatpush.bf16.msra.mxu0 %v448_v54  ;;  %v637_v54 = vld [vmem:[#allocation2 + $0x98] sm:$0xf0]  ;;  %v34_v63 = vld [vmem:[%s737_s1] sm:$0xff]  ;;  %v571_v10 = vld [vmem:[#allocation2 + $0x10] sm:$0xf] }
  0x21   :  { %320 = vmatpush.bf16.msra.mxu3 %v560_v18  ;;  %v584_v56 = vor.u32 %v637_v54, %v583_v53  ;;  %v634_v11 = vld [vmem:[#allocation2 + $0x20] sm:$0xf0]  ;;  %v646_v13 = vld [vmem:[%s739_s3 + $0x3] ss:$0 sm:$0xff] }
  0x22   :  { %v572_v12 = vor.u32 %v634_v11, %v571_v10  ;;  %v647_v19 = vld [vmem:[%s739_s3 + $0x4] ss:$0 sm:$0xff] }
  0x23   :  { %227 = vmatpush.bf16.msra.mxu1 %v484_v1  ;;  %240 = vmatpush.bf16.msra.mxu2 %v488_v3 }
  0x24   :  { %111 = vmatpush.bf16.msra.mxu0 %v444_v59 }
  0x25   :  { %321 = vmatpush.bf16.msra.mxu3 %v556_v21 }
  0x27   :  { %112 = vmatmul.bf16.vlgmr.msra.gmra.mxu0 %v35_v61  ;;  %228 = vmatpush.bf16.msra.mxu1 %v476_v7  ;;  %v580_v61 = vor.u32 %v636_v58, %v579_v57  ;;  %v575_v7 = vld [vmem:[#allocation2 + $0x38] sm:$0xf] }
  0x28   :  { %241 = vmatpush.bf16.msra.mxu2 %v480_v9  ;;  %401 = vmatpush.bf16.msrb.mxu0 %v600_v43  ;;  %v576_v9 = vor.u32 %v635_v8, %v575_v7 }
  0x29   :  { %322 = vmatpush.bf16.msra.mxu3 %v552_v30 }
  0x2c   :  { %402 = vmatpush.bf16.msrb.mxu0 %v596_v45 }
  0x2d   :  { %323 = vmatpush.bf16.msra.mxu3 %v548_v33 }
  0x30   :  { %403 = vmatpush.bf16.msrb.mxu0 %v592_v48 }
  0x31   :  { %324 = vmatpush.bf16.msra.mxu3 %v544_v36 }
  0x34   :  { %404 = vmatpush.bf16.msrb.mxu0 %v588_v52 }
  0x35   :  { %325 = vmatpush.bf16.msra.mxu3 %v540_v39 }
  0x38   :  { %405 = vmatpush.bf16.msrb.mxu0 %v584_v56 }
  0x3c   :  { %406 = vmatpush.bf16.msrb.mxu0 %v580_v61 }
  0x40   :  { %407 = vmatpush.bf16.msrb.mxu0 %v576_v9 }
  0x44   :  { %408 = vmatpush.bf16.msrb.mxu0 %v572_v12 }
  0xa4   :  { %v113_v23 = vpop.f32.mrf.mxu0 }
  0xa5   :  { %v114_v24 = vadd.f32 %v645_v22, %v113_v23 }
  0xa7   :  { %v117_v25 = vmax.f32 %v114_v24, 0.0 }
  0xa9   :  { %v118_v26 = vpack.c.bf16 %v117_v25, %v117_v25 }
  0xab   :  { %229 = vmatmul.bf16.vlgmr.msra.gmra.mxu1 %v118_v26  ;;  %242 = vmatmul.bf16.vlgmr.msra.gmra.mxu2 %v118_v26 }
  0xac   :  { %v115_v27 = vpop.f32.mrf.mxu0 }
 0x128   :  { %v230_v59 = vpop.f32.mrf.mxu1 }
 0x129   :  { %v231_v60 = vadd.f32 %v230_v59, %v137_v55 }
 0x12b   :  { %434 = vst [vmem:[%s740_s4 + $0x8] sm:$0xff] %v231_v60 }
 0x12e   :  { %v243_v0 = vpop.f32.mrf.mxu2 }
 0x12f   :  { %v244_v1 = vadd.f32 %v243_v0, %v138_v62 }
 0x130   :  { %v232_v2 = vpop.f32.mrf.mxu1 }
 0x131   :  { %v247_v3 = vmul.f32 %v244_v1, %v34_v63  ;;  %435 = vst [vmem:[%s740_s4 + $0x10] sm:$0xff] %v244_v1 }
 0x133   :  { %v248_v4 = vadd.f32 %v247_v3, %v231_v60 }
 0x135   :  { %v249_v5 = vpack.c.bf16 %v248_v4, %v248_v4 }
 0x136   :  { %v245_v6 = vpop.f32.mrf.mxu2 }
 0x137   :  { %326 = vmatmul.bf16.vlgmr.msra.gmra.mxu3 %v249_v5 }
 0x1ba   :  { %v327_v14 = vpop.f32.mrf.mxu3 }
 0x1bb   :  { %v328_v15 = vadd.f32 %v646_v13, %v327_v14 }
 0x1bd   :  { %v331_v16 = vmax.f32 %v328_v15, 0.0 }
 0x1bf   :  { %v332_v17 = vpack.c.bf16 %v331_v16, %v331_v16 }
 0x1c1   :  { %409 = vmatmul.bf16.vlgmr.msrb.gmra.mxu0 %v332_v17 }
 0x1c2   :  { %v329_v18 = vpop.f32.mrf.mxu3 }
 0x23e   :  { %v410_v20 = vpop.f32.mrf.mxu0 }
 0x23f   :  { %v411_v21 = vadd.f32 %v647_v19, %v410_v20 }
 0x241   :  { %v601_v22 = vmul.f32 -1.442695, %v411_v21 }
 0x243   :  { %648 = vpow2.f32 %v601_v22 }
 0x246   :  { %v412_v23 = vpop.f32.mrf.mxu0 }
 0x249   :  { %v649_v24 = vpop.eup %648 }
 0x24a   :  { %v417_v25 = vadd.f32 1.0, %v649_v24 }
 0x24c   :  { %650 = vrcp.f32 %v417_v25  ;;  %v429_v29 = vand.u32 2147483648, %v417_v25  ;;  %v427_v31 = vand.u32 2147483647, %v417_v25  ;;  %vm423_vm1 = vweird.f32 %v417_v25 }
 0x24e   :  { %v430_v33 = vor.u32 1.1754944e-38, %v429_v29  ;;  %vm428_vm3 = vcmp.eq.f32.partialorder %v427_v31, 8.507059e+37 }
 0x252   :  { %v651_v26 = vpop.eup %650 }
 0x253   :  { %v419_v27 = vmul.f32 %v651_v26, %v417_v25  ;;  %vm424_vm0 = vweird.f32 %v651_v26 }
 0x254   :  { %vm425_vm2 = vmor %vm423_vm1, %vm424_vm0 }
 0x255   :  { %v420_v28 = vsub.f32 1.0, %v419_v27 }
 0x257   :  { %v421_v30 = vmul.f32 %v651_v26, %v420_v28 }
 0x259   :  { %v422_v32 = vadd.f32 %v651_v26, %v421_v30 }
 0x25b   :  { %v426_v34 = vsel %vm425_vm2, %v651_v26, %v422_v32 }
 0x25c   :  { %v431_v35 = vsel %vm428_vm3, %v430_v33, %v426_v34 }
 0x25d   :  { %433 = vst [vmem:[%s740_s4] sm:$0xff] %v431_v35 }
 0x25e   :  { %440 = vsyncpa [#allocation3], 1 }

</bundles_post_ra>
